<compile_context>
chip_gen: v7x
topology: tpu7x:2x2x1
jax: 0.10.0
libtpu: 0.0.40
codegen_flags: <defaults>
</compile_context>

<pallas_src>
import jax
import jax.numpy as jnp
from jax.experimental import pallas as pl
from jax.experimental.pallas import tpu as pltpu


def _mlp_kernel(x_ref, w1_ref, b1_ref, w2_ref, b2_ref, o_ref):
    # ---- hot path: two bf16 MXU matmuls (f32 acc) + bias + ReLU, all in VMEM ----
    x = x_ref[...]                                               # (TM, 512) f32
    h = jnp.dot(x.astype(jnp.bfloat16), w1_ref[...],
                preferred_element_type=jnp.float32)              # (TM, H) f32 acc
    h = jnp.maximum(h + b1_ref[...], 0.0)                        # bias + ReLU (VPU)
    y = jnp.dot(h.astype(jnp.bfloat16), w2_ref[...],
                preferred_element_type=jnp.float32)              # (TM, C_pad) f32 acc
    o_ref[...] = y + b2_ref[...]                                 # lane-dense store


def blip2clip_text_mlp(x, w1, b1, w2, b2, *, block_m=128):
    """x: (B, 512) f32; w1: (512, H); b1: (H,); w2: (H, C); b2: (C,).

    Weights may be passed as f32 or bf16; they are fed to the kernel as bf16.
    Returns (B, C) float32.
    """
    B, Din = x.shape
    H = w1.shape[1]
    C = w2.shape[1]

    # bf16 weights: halves dominant HBM->VMEM DMA, native bf16 MXU on v5e/v6e/v7x.
    w1_bf = w1.astype(jnp.bfloat16)
    w2_bf = w2.astype(jnp.bfloat16)

    # Lane-dense output: pad class dim up to a multiple of 128 (zeros are exact).
    C_pad = 128 * pl.cdiv(C, 128)
    w2_p = jnp.zeros((H, C_pad), jnp.bfloat16).at[:, :C].set(w2_bf)
    b2_p = jnp.zeros((1, C_pad), jnp.float32).at[:, :C].set(b2.astype(jnp.float32))
    b1_2d = b1.reshape(1, H).astype(jnp.float32)

    # Batch tiling: TM rows per grid step (sublane-aligned).  TM=128 keeps the
    # v5e 4x128 MXU saturated; for v7x/v6e a larger block_m can be passed in.
    TM = min(block_m, 8 * pl.cdiv(B, 8))
    grid_m = pl.cdiv(B, TM)
    B_pad = grid_m * TM
    if B_pad != B:
        x = jnp.zeros((B_pad, Din), x.dtype).at[:B].set(x)

    flops = 2 * B_pad * (Din * H + H * C_pad)
    bytes_accessed = (x.size * x.dtype.itemsize
                      + w1_bf.size * 2 + w2_p.size * 2
                      + b1_2d.size * 4 + b2_p.size * 4
                      + B_pad * C_pad * 4)

    # NOTE: weights use a constant index_map, so they are DMA'd once and stay
    # VMEM-resident across batch tiles.  If hidden_dim scales far beyond 128,
    # cap their buffering (pipeline_mode=pl.Buffered(1)) / vmem_limit_bytes.
    out = pl.pallas_call(
        _mlp_kernel,
        out_shape=jax.ShapeDtypeStruct((B_pad, C_pad), jnp.float32),
        grid=(grid_m,),
        in_specs=[
            pl.BlockSpec((TM, Din), lambda i: (i, 0)),     # x: tiled over batch
            pl.BlockSpec((Din, H), lambda i: (0, 0)),      # w1: resident
            pl.BlockSpec((1, H), lambda i: (0, 0)),        # b1: resident
            pl.BlockSpec((H, C_pad), lambda i: (0, 0)),    # w2: resident
            pl.BlockSpec((1, C_pad), lambda i: (0, 0)),    # b2: resident
        ],
        out_specs=pl.BlockSpec((TM, C_pad), lambda i: (i, 0)),
        compiler_params=pltpu.CompilerParams(
            dimension_semantics=("parallel",),
        ),
        cost_estimate=pl.CostEstimate(
            flops=flops, transcendentals=0, bytes_accessed=bytes_accessed),
    )(x, w1_bf, b1_2d, w2_p, b2_p)

    # TODO(synk): for a fixed classifier head, hide the weight DMA entirely by
    # fusing into the upstream text-encoder Pallas call or via cross-call prefetch.
    return out[:B, :C]


def init_params(key, hidden_dim, num_classes, in_dim=512):
    """Deterministic init mimicking nn.Linear default (uniform +/- 1/sqrt(fan_in)).

    Weights returned as (in, out) — transposed relative to PyTorch storage.
    """
    k1, k2, k3, k4 = jax.random.split(key, 4)
    lim1 = 1.0 / jnp.sqrt(jnp.float32(in_dim))
    lim2 = 1.0 / jnp.sqrt(jnp.float32(hidden_dim))
    w1 = jax.random.uniform(k1, (in_dim, hidden_dim), jnp.float32, -lim1, lim1)
    b1 = jax.random.uniform(k2, (hidden_dim,), jnp.float32, -lim1, lim1)
    w2 = jax.random.uniform(k3, (hidden_dim, num_classes), jnp.float32, -lim2, lim2)
    b2 = jax.random.uniform(k4, (num_classes,), jnp.float32, -lim2, lim2)
    return w1, b1, w2, b2


if __name__ == "__main__":
    key = jax.random.PRNGKey(0)
    k_x, k_p = jax.random.split(key)

    batch = 8
    hidden_dim = 128
    num_classes = 16

    x = jax.random.normal(k_x, (batch, 512), jnp.float32)
    w1, b1, w2, b2 = init_params(k_p, hidden_dim, num_classes)

    out = blip2clip_text_mlp(x, w1, b1, w2, b2)
    out = jax.block_until_ready(out)
    assert out.shape == (batch, num_classes)

    # Reference in plain JAX using the same bf16 weights / f32 accumulation.
    w1_bf = w1.astype(jnp.bfloat16)
    w2_bf = w2.astype(jnp.bfloat16)
    h_ref = jnp.maximum(
        jnp.dot(x.astype(jnp.bfloat16), w1_bf,
                preferred_element_type=jnp.float32) + b1, 0.0)
    ref = jnp.dot(h_ref.astype(jnp.bfloat16), w2_bf,
                  preferred_element_type=jnp.float32) + b2
    assert jnp.allclose(out, ref, atol=2e-2, rtol=2e-2), (
        jnp.max(jnp.abs(out - ref)))

    # Sanity vs. full-f32 math (loose: bf16 weight quantization error).
    ref_f32 = jnp.maximum(x @ w1 + b1, 0.0) @ w2 + b2
    assert jnp.allclose(out, ref_f32, atol=1e-1, rtol=1e-1)

    print("KERNEL_OK")
</pallas_src>

<mosaic_0001>
module attributes {stable_mosaic.version = 11 : i64} {
  func.func @_mlp_kernel(%arg0: i32, %arg1: memref<8x512xf32, #tpu.memory_space<vmem>>, %arg2: memref<512x128xbf16, #tpu.memory_space<vmem>>, %arg3: memref<1x128xf32, #tpu.memory_space<vmem>>, %arg4: memref<128x128xbf16, #tpu.memory_space<vmem>>, %arg5: memref<1x128xf32, #tpu.memory_space<vmem>>, %arg6: memref<8x128xf32, #tpu.memory_space<vmem>>) attributes {dimension_semantics = [#tpu.dimension_semantics<parallel>], iteration_bounds = array<i64: 1>, scalar_prefetch = 0 : i64, scratch_operands = 0 : i64, tpu.core_type = #tpu.core_type<tc>, window_params = [{transform_indices = @transform_0, window_bounds = array<i64: 8, 512>}, {pipeline_mode = #tpu.pipeline_mode<synchronous>, transform_indices = @transform_1, window_bounds = array<i64: 512, 128>}, {pipeline_mode = #tpu.pipeline_mode<synchronous>, transform_indices = @transform_2, window_bounds = array<i64: 1, 128>}, {pipeline_mode = #tpu.pipeline_mode<synchronous>, transform_indices = @transform_3, window_bounds = array<i64: 128, 128>}, {pipeline_mode = #tpu.pipeline_mode<synchronous>, transform_indices = @transform_4, window_bounds = array<i64: 1, 128>}, {transform_indices = @transform_5, window_bounds = array<i64: 8, 128>}]} {
    %c0 = arith.constant 0 : index
    %c0_0 = arith.constant 0 : index
    %0 = vector.load %arg1[%c0, %c0_0] : memref<8x512xf32, #tpu.memory_space<vmem>>, vector<8x512xf32>
    %1 = arith.truncf %0 : vector<8x512xf32> to vector<8x512xbf16>
    %c0_1 = arith.constant 0 : index
    %c0_2 = arith.constant 0 : index
    %2 = vector.load %arg2[%c0_1, %c0_2] : memref<512x128xbf16, #tpu.memory_space<vmem>>, vector<512x128xbf16>
    %cst = arith.constant dense<0.000000e+00> : vector<8x128xf32>
    %3 = tpu.matmul %1, %2, %cst {dimension_numbers = #tpu.dot_dimension_numbers<[1], [0], [0], [1], [0, 0, 1, 1], [], []>} : vector<8x512xbf16>, vector<512x128xbf16>, vector<8x128xf32> -> vector<8x128xf32>
    %c0_3 = arith.constant 0 : index
    %c0_4 = arith.constant 0 : index
    %4 = vector.load %arg3[%c0_3, %c0_4] : memref<1x128xf32, #tpu.memory_space<vmem>>, vector<1x128xf32>
    %5 = vector.broadcast %4 : vector<1x128xf32> to vector<8x128xf32>
    %6 = arith.addf %3, %5 : vector<8x128xf32>
    %cst_5 = arith.constant 0.000000e+00 : f32
    %7 = vector.broadcast %cst_5 : f32 to vector<8x128xf32>
    %8 = arith.maximumf %6, %7 : vector<8x128xf32>
    %9 = arith.truncf %8 : vector<8x128xf32> to vector<8x128xbf16>
    %c0_6 = arith.constant 0 : index
    %c0_7 = arith.constant 0 : index
    %10 = vector.load %arg4[%c0_6, %c0_7] : memref<128x128xbf16, #tpu.memory_space<vmem>>, vector<128x128xbf16>
    %cst_8 = arith.constant dense<0.000000e+00> : vector<8x128xf32>
    %11 = tpu.matmul %9, %10, %cst_8 {dimension_numbers = #tpu.dot_dimension_numbers<[1], [0], [0], [1], [0, 0, 1, 1], [], []>} : vector<8x128xbf16>, vector<128x128xbf16>, vector<8x128xf32> -> vector<8x128xf32>
    %c0_9 = arith.constant 0 : index
    %c0_10 = arith.constant 0 : index
    %12 = vector.load %arg5[%c0_9, %c0_10] : memref<1x128xf32, #tpu.memory_space<vmem>>, vector<1x128xf32>
    %13 = vector.broadcast %12 : vector<1x128xf32> to vector<8x128xf32>
    %14 = arith.addf %11, %13 : vector<8x128xf32>
    %c0_11 = arith.constant 0 : index
    %c0_12 = arith.constant 0 : index
    %15 = vector.load %arg6[%c0_11, %c0_12] : memref<8x128xf32, #tpu.memory_space<vmem>>, vector<8x128xf32>
    tpu.vector_store %arg6[%c0_11, %c0_12], %14 {strides = array<i32>} : memref<8x128xf32, #tpu.memory_space<vmem>>, vector<8x128xf32>,
    return
  }
  func.func @transform_0(%arg0: i32) -> (i32, i32) {
    %c0_i32 = arith.constant 0 : i32
    %c0_i32_0 = arith.constant 0 : i32
    return %arg0, %c0_i32 : i32, i32
  }
  func.func @transform_1(%arg0: i32) -> (i32, i32) {
    %c0_i32 = arith.constant 0 : i32
    %c0_i32_0 = arith.constant 0 : i32
    %c0_i32_1 = arith.constant 0 : i32
    return %c0_i32, %c0_i32_0 : i32, i32
  }
  func.func @transform_2(%arg0: i32) -> (i32, i32) {
    %c0_i32 = arith.constant 0 : i32
    %c0_i32_0 = arith.constant 0 : i32
    %c0_i32_1 = arith.constant 0 : i32
    return %c0_i32, %c0_i32_0 : i32, i32
  }
  func.func @transform_3(%arg0: i32) -> (i32, i32) {
    %c0_i32 = arith.constant 0 : i32
    %c0_i32_0 = arith.constant 0 : i32
    %c0_i32_1 = arith.constant 0 : i32
    return %c0_i32, %c0_i32_0 : i32, i32
  }
  func.func @transform_4(%arg0: i32) -> (i32, i32) {
    %c0_i32 = arith.constant 0 : i32
    %c0_i32_0 = arith.constant 0 : i32
    %c0_i32_1 = arith.constant 0 : i32
    return %c0_i32, %c0_i32_0 : i32, i32
  }
  func.func @transform_5(%arg0: i32) -> (i32, i32) {
    %c0_i32 = arith.constant 0 : i32
    %c0_i32_0 = arith.constant 0 : i32
    return %arg0, %c0_i32 : i32, i32
  }
}

</mosaic_0001>

<bundles_post_ra>
// kernel: tpu_custom_call.1
= control target key start
LH: loop header
LB: loop body
LE: loop exit
PB: predicated region body
PF: predicated region fallthrough
CT: control target
= control target key end

     0   :  { %10 = vsyncpa [#allocation3], 0  ;;  %s897_s0 = inlined_call_operand.hbm [shape: f32[8,512], index: 0, kind: input, shape index: {}]   ;;  %s898_s1 = inlined_call_operand.hbm [shape: bf16[512,128], index: 1, kind: input, shape index: {}]   ;;  %s899_s2 = inlined_call_operand.vmem [shape: f32[1,128], index: 2, kind: input, shape index: {}]   ;;  %s900_s3 = inlined_call_operand.hbm [shape: bf16[128,128], index: 3, kind: input, shape index: {}]   ;;  %s901_s4 = inlined_call_operand.vmem [shape: f32[1,128], index: 4, kind: input, shape index: {}]   ;;  %s902_s5 = inlined_call_operand.hbm [shape: f32[8,128], index: 5, kind: output, shape index: {}]  }
   0x1   :  { %11 = vsyncpa [#allocation6], 0 }
   0x2   :  { %12 = vsyncpa [#allocation4], 0  ;;  %s799_s18 = smov [#allocation5]   ;;  %s705_s22 = scalar_lea.hbm %s898_s1, 4096 }
   0x3   :  { %s28_s19 = sshll.u32 %s799_s18, 4  ;;  %p706_p0 = scmp.ne.s32.totalorder %s898_s1, %s705_s22  ;;  %s29_s19 = int_to_ptr.vmem [resolvable:$true] %s28_s19 }
   0x4   :  { %p709_p1 = scmp.lt.u32.totalorder %s705_s22, %s898_s1 }
   0x6   :  { %p711_p2 = pnand %p709_p1, %p706_p0 }
   0x8   :  { %714 = shalt.err (!%p711_p2)
}
   0x9   :  { %s715_s27 = scalar_lea.vmem %s29_s19, 4096  ;;  %p720_p4 = scmp.lt.s32.totalorder %s29_s19, %s29_s19 }
   0xa   :  { %p716_p3 = scmp.ne.s32.totalorder %s29_s19, %s715_s27  ;;  %p721_p5 = scmp.lt.s32.totalorder %s715_s27, %s715_s27 }
   0xc   :  { %p722_p6 = por %p721_p5, %p720_p4 }
   0xe   :  { %p723_p7 = pnand %p722_p6, %p716_p3 }
  0x10   :  { %726 = shalt.err (!%p723_p7)
}
  0x11   :  { %s800_s28 = smov 64   ;;  %s801_s29 = smov 4  }
  0x12   :  { %34 = dma.hbm_to_vmem [thread:$0]  %s898_s1, 4096, %s29_s19, [#allocation6], %s800_s28, %s800_s28, %s801_s29  }
  0x13   :  { %s802_s7 = smov [#allocation2]   ;;  %s803_s9 = smov [#allocation7]  }
  0x14   :  { %s19_s8 = sshll.u32 %s802_s7, 4  ;;  %s42_s10 = sshll.u32 %s803_s9, 4  ;;  %s20_s8 = int_to_ptr.vmem [resolvable:$true] %s19_s8  ;;  %s43_s10 = int_to_ptr.vmem [resolvable:$true] %s42_s10 }
  0x15   :  { %s727_s13 = scalar_lea.hbm %s897_s0, 512 }
  0x16   :  { %p728_p8 = scmp.ne.s32.totalorder %s897_s0, %s727_s13  ;;  %p731_p9 = scmp.lt.u32.totalorder %s727_s13, %s897_s0 }
  0x18   :  { %p733_p10 = pnand %p731_p9, %p728_p8 }
  0x1a   :  { %736 = shalt.err (!%p733_p10)
}
  0x1b   :  { %s737_s1 = scalar_lea.vmem %s20_s8, 512  ;;  %p742_p12 = scmp.lt.s32.totalorder %s20_s8, %s20_s8 }
  0x1c   :  { %p738_p11 = scmp.ne.s32.totalorder %s20_s8, %s737_s1  ;;  %p743_p13 = scmp.lt.s32.totalorder %s737_s1, %s737_s1 }
  0x1e   :  { %p744_p0 = por %p743_p13, %p742_p12 }
  0x20   :  { %p745_p1 = pnand %p744_p0, %p738_p11 }
  0x22   :  { %748 = shalt.err (!%p745_p1)
}
  0x23   :  { %22 = dma.hbm_to_vmem [thread:$0]  %s897_s0, 512, %s20_s8, [#allocation3]  }
  0x24   :  { %s749_s22 = scalar_lea.hbm %s900_s3, 1024 }
  0x25   :  { %p750_p2 = scmp.ne.s32.totalorder %s900_s3, %s749_s22  ;;  %p753_p3 = scmp.lt.u32.totalorder %s749_s22, %s900_s3 }
  0x27   :  { %p755_p4 = pnand %p753_p3, %p750_p2 }
  0x29   :  { %758 = shalt.err (!%p755_p4)
}
  0x2a   :  { %s759_s27 = scalar_lea.vmem %s43_s10, 1024  ;;  %p764_p6 = scmp.lt.s32.totalorder %s43_s10, %s43_s10 }
  0x2b   :  { %p760_p5 = scmp.ne.s32.totalorder %s43_s10, %s759_s27  ;;  %p765_p7 = scmp.lt.s32.totalorder %s759_s27, %s759_s27 }
  0x2d   :  { %p766_p8 = por %p765_p7, %p764_p6 }
  0x2f   :  { %p767_p9 = pnand %p766_p8, %p760_p5 }
  0x31   :  { %770 = shalt.err (!%p767_p9)
}
  0x32   :  { %48 = dma.hbm_to_vmem [thread:$0]  %s900_s3, 1024, %s43_s10, [#allocation6], %s800_s28, %s800_s28, %s801_s29  }
  0x33   :  { %793 = dma.done.wait [#allocation3], 512  }
  0x34   :  { %794 = vsyncadd [#allocation3], 4294966784 }
  0x35   :  { %795 = dma.done.wait [#allocation6], 5120  }
  0x36   :  { %796 = vsyncadd [#allocation6], 4294962176  ;;  %v665_v0 = vld [vmem:[#allocation5 + $0x40] sm:$0xff]   ;;  %v669_v4 = vld [vmem:[#allocation5 + $0x48] sm:$0xff]   ;;  %v804_v39 = vmov 0.0   ;;  %vm805_vm0 = vmmov 0  }
  0x37   :  { %v666_v1 = vld [vmem:[#allocation5 + $0xc0] sm:$0xff]   ;;  %584 = vmatprep.subr.bf16.mxu0 %v665_v0  ;;  %v670_v5 = vld [vmem:[#allocation5 + $0xc8] sm:$0xff]   ;;  %v673_v8 = vld [vmem:[#allocation5 + $0x50] sm:$0xff]   ;;  %s806_s7 = smov [#allocation8]  }
  0x38   :  { %v667_v2 = vld [vmem:[#allocation5] sm:$0xff]   ;;  %606 = vmatprep.subr.bf16.mxu1 %v666_v1  ;;  %v671_v6 = vld [vmem:[#allocation5 + $0x8] sm:$0xff]   ;;  %v674_v9 = vld [vmem:[#allocation5 + $0xd0] sm:$0xff]   ;;  %s532_s8 = sshll.u32 %s806_s7, 4  ;;  %s533_s8 = int_to_ptr.vmem [resolvable:$true] %s532_s8 }
  0x39   :  { %v668_v3 = vld [vmem:[#allocation5 + $0x80] sm:$0xff]   ;;  %585 = vmatpush3.bf16.msra.mxu0 %v667_v2  ;;  %v672_v7 = vld [vmem:[#allocation5 + $0x88] sm:$0xff]   ;;  %v675_v10 = vld [vmem:[#allocation5 + $0x10] sm:$0xff]   ;;  %p776_p11 = scmp.lt.s32.totalorder %s533_s8, %s533_s8 }
  0x3a   :  { %607 = vmatpush3.bf16.msra.mxu1 %v668_v3  ;;  %586 = vmatprep.subr.bf16.mxu0 %v669_v4  ;;  %v676_v11 = vld [vmem:[#allocation5 + $0x90] sm:$0xff]   ;;  %v677_v12 = vld [vmem:[#allocation5 + $0x58] sm:$0xff]   ;;  %v681_v16 = vld [vmem:[#allocation5 + $0x60] sm:$0xff]  }
  0x3b   :  { %608 = vmatprep.subr.bf16.mxu1 %v670_v5  ;;  %v678_v13 = vld [vmem:[#allocation5 + $0xd8] sm:$0xff]   ;;  %v682_v17 = vld [vmem:[#allocation5 + $0xe0] sm:$0xff]   ;;  %v685_v20 = vld [vmem:[#allocation5 + $0x68] sm:$0xff]  }
  0x3c   :  { %v679_v14 = vld [vmem:[#allocation5 + $0x18] sm:$0xff]   ;;  %v683_v18 = vld [vmem:[#allocation5 + $0x20] sm:$0xff]   ;;  %v686_v21 = vld [vmem:[#allocation5 + $0xe8] sm:$0xff]  }
  0x3d   :  { %587 = vmatpush3.bf16.msra.mxu0 %v671_v6  ;;  %v680_v15 = vld [vmem:[#allocation5 + $0x98] sm:$0xff]   ;;  %v684_v19 = vld [vmem:[#allocation5 + $0xa0] sm:$0xff]   ;;  %v687_v22 = vld [vmem:[#allocation5 + $0x28] sm:$0xff]  }
  0x3e   :  { %609 = vmatpush3.bf16.msra.mxu1 %v672_v7  ;;  %588 = vmatprep.subr.bf16.mxu0 %v673_v8  ;;  %v688_v23 = vld [vmem:[#allocation5 + $0xa8] sm:$0xff]   ;;  %v689_v24 = vld [vmem:[#allocation5 + $0x70] sm:$0xff]   ;;  %v693_v28 = vld [vmem:[#allocation5 + $0x78] sm:$0xff]  }
  0x3f   :  { %610 = vmatprep.subr.bf16.mxu1 %v674_v9  ;;  %v690_v25 = vld [vmem:[#allocation5 + $0xf0] sm:$0xff]   ;;  %v694_v29 = vld [vmem:[#allocation5 + $0xf8] sm:$0xff]   ;;  %v62_v32 = vld [vmem:[#allocation2 + $0x8] sm:$0xff] }
  0x40   :  { %v691_v26 = vld [vmem:[#allocation5 + $0x30] sm:$0xff]   ;;  %v695_v30 = vld [vmem:[#allocation5 + $0x38] sm:$0xff]   ;;  %v61_v34 = vld [vmem:[#allocation2] sm:$0xff]  ;;  %v66_v35 = vpack.c.bf16 %v62_v32, %v62_v32 }
  0x41   :  { %589 = vmatpush3.bf16.msra.mxu0 %v675_v10  ;;  %v692_v27 = vld [vmem:[#allocation5 + $0xb0] sm:$0xff]   ;;  %v696_v31 = vld [vmem:[#allocation5 + $0xb8] sm:$0xff]   ;;  %v65_v37 = vpack.c.bf16 %v61_v34, %v61_v34  ;;  %v697_v41 = vld [vmem:[#allocation7] sm:$0xff]  }
  0x42   :  { %611 = vmatpush3.bf16.msra.mxu1 %v676_v11  ;;  %590 = vmatprep.subr.bf16.mxu0 %v677_v12  ;;  %v64_v33 = vld [vmem:[#allocation2 + $0x18] sm:$0xff]  ;;  %v63_v38 = vld [vmem:[#allocation2 + $0x10] sm:$0xff]  ;;  %v698_v42 = vld [vmem:[#allocation7 + $0x8] sm:$0xff]  }
  0x43   :  { %612 = vmatprep.subr.bf16.mxu1 %v678_v13  ;;  %v68_v36 = vpack.c.bf16 %v64_v33, %v64_v33  ;;  %v67_v40 = vpack.c.bf16 %v63_v38, %v63_v38  ;;  %364 = vmatprep.mubr.bf16.mxu0 %v66_v35  ;;  %v699_v43 = vld [vmem:[#allocation7 + $0x10] sm:$0xff]   ;;  %v700_v44 = vld [vmem:[#allocation7 + $0x18] sm:$0xff]   ;;  %v701_v45 = vld [vmem:[#allocation7 + $0x20] sm:$0xff]  }
  0x44   :  { %v702_v46 = vld [vmem:[#allocation7 + $0x28] sm:$0xff]   ;;  %v703_v47 = vld [vmem:[#allocation7 + $0x30] sm:$0xff]   ;;  %v704_v48 = vld [vmem:[#allocation7 + $0x38] sm:$0xff]  }
  0x45   :  { %591 = vmatpush3.bf16.msra.mxu0 %v679_v14  ;;  %404 = vmatprep.mubr.bf16.mxu1 %v68_v36  ;;  %v542_v51 = vld [vmem:[%s899_s2] ss:$0 sm:$0xff]  ;;  %s771_s2 = scalar_lea.vmem %s533_s8, 128 }
  0x46   :  { %613 = vmatpush3.bf16.msra.mxu1 %v680_v15  ;;  %592 = vmatprep.subr.bf16.mxu0 %v681_v16  ;;  %v575_v0 = vld [vmem:[%s901_s4] ss:$0 sm:$0xff]  ;;  %p772_p10 = scmp.ne.s32.totalorder %s533_s8, %s771_s2  ;;  %p777_p12 = scmp.lt.s32.totalorder %s771_s2, %s771_s2 }
  0x47   :  { %614 = vmatprep.subr.bf16.mxu1 %v682_v17 }
  0x48   :  { %p778_p13 = por %p777_p12, %p776_p11 }
  0x49   :  { %593 = vmatpush3.bf16.msra.mxu0 %v683_v18 }
  0x4a   :  { %615 = vmatpush3.bf16.msra.mxu1 %v684_v19  ;;  %594 = vmatprep.subr.bf16.mxu0 %v685_v20  ;;  %p779_p0 = pnand %p778_p13, %p772_p10 }
  0x4b   :  { %616 = vmatprep.subr.bf16.mxu1 %v686_v21 }
  0x4d   :  { %595 = vmatpush3.bf16.msra.mxu0 %v687_v22 }
  0x4e   :  { %617 = vmatpush3.bf16.msra.mxu1 %v688_v23  ;;  %596 = vmatprep.subr.bf16.mxu0 %v689_v24 }
  0x4f   :  { %618 = vmatprep.subr.bf16.mxu1 %v690_v25 }
  0x51   :  { %597 = vmatpush3.bf16.msra.mxu0 %v691_v26 }
  0x52   :  { %619 = vmatpush3.bf16.msra.mxu1 %v692_v27  ;;  %598 = vmatprep.subr.bf16.mxu0 %v693_v28 }
  0x53   :  { %620 = vmatprep.subr.bf16.mxu1 %v694_v29 }
  0x55   :  { %599 = vmatpush3.bf16.msra.mxu0 %v695_v30 }
  0x56   :  { %621 = vmatpush3.bf16.msra.mxu1 %v696_v31  ;;  %637 = vmatprep.subr.bf16.mxu0 %v804_v39 }
  0x58   :  { %365 = vmatmul.mubr.bf16.vlgmr.msra.gmra.mrb[0].mxu0 %v65_v37 }
  0x59   :  { %405 = vmatmul.mubr.bf16.vlgmr.msra.gmra.mrb[0].mxu1 %v67_v40  ;;  %638 = vmatpush3.bf16.msra.mxu0 %v697_v41 }
  0x5a   :  { %639 = vmatprep.subr.bf16.mxu0 %v804_v39  ;;  %653 = vmatprep.mubr.msk.bf16.mxu0 %vm805_vm0, %v804_v39 }
  0x5d   :  { %640 = vmatpush3.bf16.msra.mxu0 %v698_v42 }
  0x5e   :  { %641 = vmatprep.subr.bf16.mxu0 %v804_v39 }
  0x61   :  { %642 = vmatpush3.bf16.msra.mxu0 %v699_v43 }
  0x62   :  { %643 = vmatprep.subr.bf16.mxu0 %v804_v39 }
  0x65   :  { %644 = vmatpush3.bf16.msra.mxu0 %v700_v44 }
  0x66   :  { %645 = vmatprep.subr.bf16.mxu0 %v804_v39 }
  0x69   :  { %646 = vmatpush3.bf16.msra.mxu0 %v701_v45 }
  0x6a   :  { %647 = vmatprep.subr.bf16.mxu0 %v804_v39 }
  0x6d   :  { %648 = vmatpush3.bf16.msra.mxu0 %v702_v46 }
  0x6e   :  { %649 = vmatprep.subr.bf16.mxu0 %v804_v39 }
  0x71   :  { %650 = vmatpush3.bf16.msra.mxu0 %v703_v47 }
  0x72   :  { %651 = vmatprep.subr.bf16.mxu0 %v804_v39 }
  0x75   :  { %652 = vmatpush3.bf16.msra.mxu0 %v704_v48 }
 0x12b   :  { %v600_v49 = vpop.f32.mrb[0].mxu0 }
 0x12c   :  { %v622_v50 = vpop.f32.mrb[0].mxu1  ;;  %v601_v52 = vpop.f32.mrb[1].mxu0 }
 0x12d   :  { %v623_v53 = vpop.f32.mrb[1].mxu1  ;;  %v602_v54 = vadd.f32 %v601_v52, %v600_v49  ;;  %v603_v56 = vpop.f32.mrb[2].mxu0 }
 0x12e   :  { %v624_v55 = vadd.f32 %v623_v53, %v622_v50  ;;  %v625_v57 = vpop.f32.mrb[2].mxu1  ;;  %v604_v58 = vpop.f32.mrb[3].mxu0 }
 0x12f   :  { %v626_v59 = vpop.f32.mrb[3].mxu1  ;;  %v367_v60 = vadd.f32 %v602_v54, %v542_v51 }
 0x131   :  { %v407_v61 = vadd.f32 %v624_v55, %v367_v60 }
 0x133   :  { %v412_v62 = vmax.f32 %v407_v61, 0.0 }
 0x135   :  { %v413_v63 = vpack.c.bf16 %v412_v62, %v412_v62 }
 0x137   :  { %654 = vmatmul.mubr.bf16.vlgmr.msra.gmra.mrb[4].mxu0 %v413_v63 }
 0x20a   :  { %v519_v1 = vpop.f32.mrb[4].mxu0 }
 0x20b   :  { %v520_v2 = vadd.f32 %v575_v0, %v519_v1  ;;  %v655_v3 = vpop.f32.mrb[5].mxu0 }
 0x20c   :  { %v522_v4 = vpop.f32.mrb[6].mxu0 }
 0x20d   :  { %525 = vst [vmem:[#allocation8] sm:$0xff] %v520_v2  ;;  %v656_v5 = vpop.f32.mrb[7].mxu0 }
 0x20e   :  { %782 = shalt.err (!%p779_p0)
}
 0x20f   :  { %s783_s4 = scalar_lea.hbm %s902_s5, 128 }
 0x210   :  { %p784_p1 = scmp.ne.s32.totalorder %s902_s5, %s783_s4  ;;  %p787_p2 = scmp.lt.u32.totalorder %s783_s4, %s902_s5 }
 0x212   :  { %p789_p3 = pnand %p787_p2, %p784_p1 }
 0x214   :  { %792 = shalt.err (!%p789_p3)
}
 0x215   :  { %535 = dma.vmem_to_hbm [thread:$0]  %s533_s8, 128, %s902_s5, [#allocation4]  }
 0x216   :  { %797 = dma.done.wait [#allocation4], 128  }
 0x217   :  { %798 = vsyncadd [#allocation4], 4294967168 }
 0x218   :  { %539 = vsyncpa [#allocation3], 1 }
 0x219   :  { %540 = vsyncpa [#allocation6], 1 }
 0x21a   :  { %541 = vsyncpa [#allocation4], 1 }

</bundles_post_ra>
